<compile_context>
chip_gen: v7x
topology: tpu7x:2x2x1
jax: 0.10.0
libtpu: 0.0.40
codegen_flags: <defaults>
</compile_context>

<pallas_src>
import jax
import jax.numpy as jnp
from jax import lax
from jax.experimental import pallas as pl
from jax.experimental.pallas import tpu as pltpu


def _projection_kernel(x_ref, w_ref, b_ref, o_ref):
    # x_ref: (tm, K) activation tile (compute dtype, e.g. bf16)
    # w_ref: (tn, K) weight rows (compute dtype) -- kept (vocab, d_model), no transpose
    # b_ref: (1, tn) bias slice (f32)
    # o_ref: (tm, tn) output tile
    acc = lax.dot_general(
        x_ref[...],
        w_ref[...],
        dimension_numbers=(((1,), (1,)), ((), ())),   # contract K with K: x @ W.T
        preferred_element_type=jnp.float32,
    )
    o_ref[...] = (acc + b_ref[...]).astype(o_ref.dtype)


def _round_up(x, m):
    return (x + m - 1) // m * m


def prepare_projection_params(weight, bias, *, compute_dtype=jnp.bfloat16):
    """One-time parameter prep (hoisted out of the per-call hot path).

    weight: (vocab, d_model), bias: (vocab,).  Returns (weight_c, bias_f32_2d).
    """
    w = jnp.asarray(weight).astype(compute_dtype)            # stays (vocab, d_model)
    b = jnp.asarray(bias).astype(jnp.float32).reshape(1, -1)
    return w, b


def projection_layer(x, weight, bias2d, *, tm=256, tn=1024,
                     compute_dtype=jnp.bfloat16, out_dtype=None,
                     activation_buffers=2):
    """x: (B, S, d_model); weight: (vocab, d_model); bias2d: (1, vocab) or (vocab,).

    Returns (B, S, vocab) = x @ weight.T + bias  (same math as torch.nn.Linear).
    Pass pre-prepared params (prepare_projection_params) to avoid per-call casts.
    """
    B, S, K = x.shape
    N, Kw = weight.shape
    assert K == Kw, "weight must be (vocab_size, d_model)"
    M = B * S
    out_dtype = x.dtype if out_dtype is None else out_dtype

    cbytes = jnp.dtype(compute_dtype).itemsize
    obytes = jnp.dtype(out_dtype).itemsize

    # Clamp tiles to the (aligned) problem size; keep sublane/lane alignment.
    sub_m = 16 if cbytes == 2 else 8
    tm = min(tm, _round_up(M, sub_m))
    tn = min(tn, _round_up(N, 128))

    # Hot-path casts: no-ops when params were prepared once via prepare_projection_params.
    x2d = x.reshape(M, K).astype(compute_dtype)
    w = weight.astype(compute_dtype)
    b2d = jnp.asarray(bias2d).astype(jnp.float32).reshape(1, N)

    # Grid: vocab (weight) tiles outer, token tiles inner (fastest-varying); the weight
    # index_map depends only on j, so each weight tile streams from HBM exactly once.
    grid = (pl.cdiv(N, tn), pl.cdiv(M, tm))

    # Double-buffered per-tile VMEM footprint (+ headroom), capped below physical VMEM.
    tile_bytes = 2 * (tm * K * cbytes + tn * K * cbytes + tn * 4 + tm * tn * obytes)
    try:
        info = pltpu.get_tpu_info()
    except Exception:   # noqa: BLE001 - be robust off-TPU / older runtimes
        info = None
    vmem_cap = getattr(info, "vmem_capacity_bytes", None) or (64 << 20)
    vmem_limit = int(min(max(tile_bytes + (4 << 20), 16 << 20), int(vmem_cap * 0.75)))

    cost = pl.CostEstimate(
        flops=2 * M * N * K,
        transcendentals=0,
        bytes_accessed=M * K * cbytes + N * K * cbytes + N * 4 + M * N * obytes,
    )

    # Activation BlockSpec; optionally deeper-buffered to hide the prefetch bubble
    # when the outer (vocab) index advances and weight DMA competes with x DMA.
    if activation_buffers > 2:
        x_spec = pl.BlockSpec((tm, K), lambda j, i: (i, 0),
                              pipeline_mode=pl.Buffered(activation_buffers))
    else:
        x_spec = pl.BlockSpec((tm, K), lambda j, i: (i, 0))

    out2d = pl.pallas_call(
        _projection_kernel,
        out_shape=jax.ShapeDtypeStruct((M, N), out_dtype),
        grid_spec=pltpu.PrefetchScalarGridSpec(
            num_scalar_prefetch=0,
            grid=grid,
            in_specs=[
                x_spec,                                        # activations (full K)
                pl.BlockSpec((tn, K), lambda j, i: (j, 0)),    # weight rows (full K)
                pl.BlockSpec((1, tn), lambda j, i: (0, j)),    # bias slice
            ],
            out_specs=pl.BlockSpec((tm, tn), lambda j, i: (i, j)),
        ),
        compiler_params=pltpu.CompilerParams(
            # Only the outer vocab axis is megacore-shardable: keeps the
            # "weight streamed once per TC" property on v7x.
            dimension_semantics=("parallel", "arbitrary"),
            vmem_limit_bytes=vmem_limit,
        ),
        cost_estimate=cost,
    )(x2d, w, b2d)

    return out2d.reshape(B, S, N)


def _run_case(key, batch, seq, d_model, vocab_size):
    kx, kw, kb = jax.random.split(key, 3)

    # Deterministic parameter init (mimic nn.Linear's uniform(-1/sqrt(K), 1/sqrt(K))).
    bound = 1.0 / (d_model ** 0.5)
    weight = jax.random.uniform(kw, (vocab_size, d_model), jnp.float32, -bound, bound)
    bias = jax.random.uniform(kb, (vocab_size,), jnp.float32, -bound, bound)
    x = jax.random.normal(kx, (batch, seq, d_model), jnp.float32)

    # One-time parameter prep (hoisted out of the per-call hot path).
    w_c, b_2d = prepare_projection_params(weight, bias)

    proj = jax.jit(projection_layer)
    out = jax.block_until_ready(proj(x, w_c, b_2d))
    assert out.shape == (batch, seq, vocab_size)

    # Tight check against a bf16-input / f32-accumulate reference (same compute path).
    ref_bf16 = (
        jnp.dot(
            x.reshape(-1, d_model).astype(jnp.bfloat16),
            weight.astype(jnp.bfloat16).T,
            preferred_element_type=jnp.float32,
        ).reshape(batch, seq, vocab_size)
        + bias
    )
    assert jnp.allclose(out, ref_bf16, atol=1e-3, rtol=1e-3), float(
        jnp.max(jnp.abs(out - ref_bf16))
    )

    # Loose check against the exact f32 torch.nn.Linear math (bf16 rounding tolerance).
    ref_f32 = x @ weight.T + bias
    assert jnp.allclose(out, ref_f32, atol=2e-2, rtol=2e-2), float(
        jnp.max(jnp.abs(out - ref_f32))
    )


if __name__ == "__main__":
    key = jax.random.PRNGKey(0)
    k1, k2 = jax.random.split(key)

    # Small shapes consistent with ProjectionLayer(d_model, vocab_size).
    _run_case(k1, batch=2, seq=8, d_model=32, vocab_size=128)

    # Non-divisible M / N / K: exercises the ragged edge-block masking path
    # (no host-side padding, no output slicing).
    _run_case(k2, batch=1, seq=10, d_model=40, vocab_size=150)

    print("KERNEL_OK")
</pallas_src>

<mosaic_0001>
module attributes {stable_mosaic.version = 11 : i64} {
  func.func @_projection_kernel(%arg0: i32, %arg1: i32, %arg2: memref<16x32xbf16, #tpu.memory_space<vmem>>, %arg3: memref<128x32xbf16, #tpu.memory_space<vmem>>, %arg4: memref<1x128xf32, #tpu.memory_space<vmem>>, %arg5: memref<16x128xf32, #tpu.memory_space<vmem>>) attributes {dimension_semantics = [#tpu.dimension_semantics<parallel>, #tpu.dimension_semantics<arbitrary>], iteration_bounds = array<i64: 1, 1>, scalar_prefetch = 0 : i64, scratch_operands = 0 : i64, tpu.core_type = #tpu.core_type<tc>, window_params = [{transform_indices = @transform_0, window_bounds = array<i64: 16, 32>}, {transform_indices = @transform_1, window_bounds = array<i64: 128, 32>}, {transform_indices = @transform_2, window_bounds = array<i64: 1, 128>}, {transform_indices = @transform_3, window_bounds = array<i64: 16, 128>}]} {
    %c0 = arith.constant 0 : index
    %c0_0 = arith.constant 0 : index
    %0 = vector.load %arg2[%c0, %c0_0] : memref<16x32xbf16, #tpu.memory_space<vmem>>, vector<16x32xbf16>
    %c0_1 = arith.constant 0 : index
    %c0_2 = arith.constant 0 : index
    %1 = vector.load %arg3[%c0_1, %c0_2] : memref<128x32xbf16, #tpu.memory_space<vmem>>, vector<128x32xbf16>
    %cst = arith.constant dense<0.000000e+00> : vector<16x128xf32>
    %2 = tpu.matmul %0, %1, %cst {dimension_numbers = #tpu.dot_dimension_numbers<[1], [1], [0], [0], [0, 0, 1, 0], [], []>} : vector<16x32xbf16>, vector<128x32xbf16>, vector<16x128xf32> -> vector<16x128xf32>
    %c0_3 = arith.constant 0 : index
    %c0_4 = arith.constant 0 : index
    %3 = vector.load %arg4[%c0_3, %c0_4] : memref<1x128xf32, #tpu.memory_space<vmem>>, vector<1x128xf32>
    %4 = vector.broadcast %3 : vector<1x128xf32> to vector<16x128xf32>
    %5 = arith.addf %2, %4 : vector<16x128xf32>
    %c0_5 = arith.constant 0 : index
    %c0_6 = arith.constant 0 : index
    %6 = vector.load %arg5[%c0_5, %c0_6] : memref<16x128xf32, #tpu.memory_space<vmem>>, vector<16x128xf32>
    tpu.vector_store %arg5[%c0_5, %c0_6], %5 {strides = array<i32>} : memref<16x128xf32, #tpu.memory_space<vmem>>, vector<16x128xf32>,
    return
  }
  func.func @transform_0(%arg0: i32, %arg1: i32) -> (i32, i32) {
    %c0_i32 = arith.constant 0 : i32
    %c0_i32_0 = arith.constant 0 : i32
    return %arg1, %c0_i32 : i32, i32
  }
  func.func @transform_1(%arg0: i32, %arg1: i32) -> (i32, i32) {
    %c0_i32 = arith.constant 0 : i32
    %c0_i32_0 = arith.constant 0 : i32
    return %arg0, %c0_i32 : i32, i32
  }
  func.func @transform_2(%arg0: i32, %arg1: i32) -> (i32, i32) {
    %c0_i32 = arith.constant 0 : i32
    %c0_i32_0 = arith.constant 0 : i32
    return %c0_i32, %arg0 : i32, i32
  }
  func.func @transform_3(%arg0: i32, %arg1: i32) -> (i32, i32) {
    %c0_i32 = arith.constant 0 : i32
    return %arg1, %arg0 : i32, i32
  }
}

</mosaic_0001>

<bundles_post_ra>
// kernel: projection_layer.1
= control target key start
LH: loop header
LB: loop body
LE: loop exit
PB: predicated region body
PF: predicated region fallthrough
CT: control target
= control target key end

     0   :  { %v251_v1 = vmov 0.0   ;;  %vm86_vm0 = vcmask 261120   ;;  %vm252_vm1 = vmmov 0   ;;  %s327_s0 = inlined_call_operand.vmem [shape: bf16[16,32], index: 0, kind: input, shape index: {}]   ;;  %s328_s1 = inlined_call_operand.vmem [shape: bf16[128,32], index: 1, kind: input, shape index: {}]   ;;  %s329_s2 = inlined_call_operand.vmem [shape: f32[1,128], index: 2, kind: input, shape index: {}]   ;;  %s330_s3 = inlined_call_operand.hbm [shape: f32[16,128], index: 3, kind: output, shape index: {}]  }
   0x1   :  { %v218_v0 = vld [vmem:[%s328_s1] sm:$0xff]   ;;  %193 = vmatprep.subr.bf16.mxu0 %v251_v1  ;;  %v219_v3 = vld [vmem:[%s328_s1 + $0x8] sm:$0xff]   ;;  %209 = vmatprep.mubr.msk.bf16.mxu0 %vm252_vm1, %v251_v1 }
   0x2   :  { %v91_v2 = vsel %vm86_vm0, %v218_v0, 0  ;;  %v94_v4 = vsel %vm86_vm0, %v219_v3, 0 }
   0x3   :  { %194 = vmatpush3.bf16.xpose.msra.mxu0 %v91_v2 }
   0x4   :  { %195 = vmatprep.subr.bf16.mxu0 %v251_v1 }
   0x5   :  { %8 = vsyncpa [#allocation3], 0  ;;  %v220_v5 = vld [vmem:[%s328_s1 + $0x10] sm:$0xff]   ;;  %v221_v7 = vld [vmem:[%s328_s1 + $0x18] sm:$0xff]   ;;  %s253_s5 = smov [#allocation2]  }
   0x6   :  { %v97_v6 = vsel %vm86_vm0, %v220_v5, 0  ;;  %v100_v8 = vsel %vm86_vm0, %v221_v7, 0  ;;  %v222_v9 = vld [vmem:[%s328_s1 + $0x20] sm:$0xff]   ;;  %v223_v11 = vld [vmem:[%s328_s1 + $0x28] sm:$0xff]   ;;  %v224_v13 = vld [vmem:[%s328_s1 + $0x30] sm:$0xff]   ;;  %s162_s6 = sshll.u32 %s253_s5, 4  ;;  %s163_s6 = int_to_ptr.vmem [resolvable:$true] %s162_s6 }
   0x7   :  { %v103_v10 = vsel %vm86_vm0, %v222_v9, 0  ;;  %v106_v12 = vsel %vm86_vm0, %v223_v11, 0  ;;  %v109_v14 = vsel %vm86_vm0, %v224_v13, 0  ;;  %v225_v15 = vld [vmem:[%s328_s1 + $0x38] sm:$0xff]   ;;  %v226_v17 = vld [vmem:[%s327_s0] sm:$0xff]   ;;  %s227_s1 = scalar_lea.vmem %s163_s6, 256  ;;  %p232_p1 = scmp.lt.s32.totalorder %s163_s6, %s163_s6 }
   0x8   :  { %v112_v16 = vsel %vm86_vm0, %v225_v15, 0  ;;  %v173_v18 = vld [vmem:[%s329_s2] ss:$0 sm:$0xff]  ;;  %p228_p0 = scmp.ne.s32.totalorder %s163_s6, %s227_s1  ;;  %p233_p2 = scmp.lt.s32.totalorder %s227_s1, %s227_s1 }
   0xa   :  { %p234_p3 = por %p233_p2, %p232_p1 }
   0xb   :  { %196 = vmatpush3.bf16.xpose.msra.mxu0 %v94_v4 }
   0xc   :  { %197 = vmatprep.subr.bf16.mxu0 %v251_v1  ;;  %p235_p4 = pnand %p234_p3, %p228_p0 }
  0x13   :  { %198 = vmatpush3.bf16.xpose.msra.mxu0 %v97_v6 }
  0x14   :  { %199 = vmatprep.subr.bf16.mxu0 %v251_v1 }
  0x1b   :  { %200 = vmatpush3.bf16.xpose.msra.mxu0 %v100_v8 }
  0x1c   :  { %201 = vmatprep.subr.bf16.mxu0 %v251_v1 }
  0x23   :  { %202 = vmatpush3.bf16.xpose.msra.mxu0 %v103_v10 }
  0x24   :  { %203 = vmatprep.subr.bf16.mxu0 %v251_v1 }
  0x2b   :  { %204 = vmatpush3.bf16.xpose.msra.mxu0 %v106_v12 }
  0x2c   :  { %205 = vmatprep.subr.bf16.mxu0 %v251_v1 }
  0x33   :  { %206 = vmatpush3.bf16.xpose.msra.mxu0 %v109_v14 }
  0x34   :  { %207 = vmatprep.subr.bf16.mxu0 %v251_v1 }
  0x3b   :  { %208 = vmatpush3.bf16.xpose.msra.mxu0 %v112_v16 }
  0x42   :  { %210 = vmatmul.mubr.msk.bf16.vlgmr.msra.gmra.mrb[0].mxu0 %vm86_vm0, %v226_v17 }
 0x115   :  { %v148_v19 = vpop.f32.mrb[0].mxu0 }
 0x116   :  { %v149_v20 = vadd.f32 %v173_v18, %v148_v19  ;;  %v211_v21 = vpop.f32.mrb[1].mxu0 }
 0x117   :  { %v151_v22 = vpop.f32.mrb[2].mxu0 }
 0x118   :  { %155 = vst [vmem:[#allocation2] sm:$0xff] %v149_v20  ;;  %v152_v23 = vadd.f32 %v173_v18, %v151_v22  ;;  %v212_v24 = vpop.f32.mrb[3].mxu0 }
 0x11a   :  { %156 = vst [vmem:[#allocation2 + $0x8] sm:$0xff] %v152_v23 }
 0x11b   :  { %238 = shalt.err (!%p235_p4)
}
 0x11c   :  { %s239_s7 = scalar_lea.hbm %s330_s3, 256 }
 0x11d   :  { %p240_p5 = scmp.ne.s32.totalorder %s330_s3, %s239_s7  ;;  %p243_p6 = scmp.lt.u32.totalorder %s239_s7, %s330_s3 }
 0x11f   :  { %p245_p7 = pnand %p243_p6, %p240_p5 }
 0x121   :  { %248 = shalt.err (!%p245_p7)
}
 0x122   :  { %s254_s12 = smov 128   ;;  %s255_s13 = smov 8  }
 0x123   :  { %168 = dma.vmem_to_hbm [thread:$0]  %s163_s6, 256, %s330_s3, [#allocation3], %s254_s12, %s254_s12, %s255_s13  }
 0x124   :  { %249 = dma.done.wait [#allocation3], 256  }
 0x125   :  { %250 = vsyncadd [#allocation3], 4294967040 }
 0x126   :  { %172 = vsyncpa [#allocation3], 1 }

</bundles_post_ra>
